<compile_context>
chip_gen: v5e
topology: v5e:2x2
jax: 0.10.0
libtpu: 0.0.40
codegen_flags: <defaults>
</compile_context>

<pallas_src>
import functools

import jax
import jax.numpy as jnp
from jax.experimental import pallas as pl
from jax.experimental.pallas import tpu as pltpu


def _round_up(x, m):
    return (x + m - 1) // m * m


def _cdiv(a, b):
    return -(-a // b)


def _vmem_budget_bytes():
    """~7/8 of physical VMEM: ~112 MiB on v5e/v6e, ~56 MiB on v7x."""
    try:
        cap = int(pltpu.get_tpu_info().vmem_capacity_bytes)
    except Exception:
        cap = 64 << 20          # conservative fallback (v7x per-TC VMEM)
    return cap * 7 // 8


def _resident_spec(block_shape, index_map):
    """BlockSpec for an operand whose block index never changes:
    single-buffer it so the constant weight/bias occupy one VMEM copy."""
    try:
        return pl.BlockSpec(block_shape, index_map, pipeline_mode=pl.Buffered(1))
    except Exception:           # older jax without pipeline_mode support
        return pl.BlockSpec(block_shape, index_map)


# ---------------------------------------------------------------------------
# Kernels
# ---------------------------------------------------------------------------
def _highway_kernel(x_ref, w_ref, b_ref, o_ref):
    # x_ref: (tm, h) native dtype; w_ref: (h, 2h) matmul dtype; b_ref: (1, 2h) f32
    x = x_ref[...]
    h = o_ref.shape[-1]
    # One fused MXU pass: [gate_pre | trans_pre] = x @ [Wg | Wa] + [bg | ba]
    xw = jnp.dot(x.astype(w_ref.dtype), w_ref[...],
                 preferred_element_type=jnp.float32) + b_ref[...]
    gate = jnp.maximum(xw[:, :h], 0.0)       # relu(trans_gate_layer(x))
    trans = jax.nn.sigmoid(xw[:, h:])        # sigmoid(affine_layer(x))
    xf = x.astype(jnp.float32)
    # gate*trans + (1-gate)*x == gate*(trans - x) + x   (one fewer VALU op)
    o_ref[...] = (gate * (trans - xf) + xf).astype(o_ref.dtype)


def _highway_kernel_ktiled(x_ref, w_ref, b_ref, o_ref, acc_ref):
    # x_ref: (tm, h); w_ref: (tk, 2h); b_ref: (1, 2h); acc_ref: (tm, 2h) f32
    k = pl.program_id(1)
    tk = w_ref.shape[0]
    h = o_ref.shape[-1]

    @pl.when(k == 0)
    def _():
        acc_ref[...] = jnp.zeros_like(acc_ref)

    start = pl.multiple_of(k * tk, tk)
    xk = x_ref[:, pl.ds(start, tk)]
    acc_ref[...] += jnp.dot(xk.astype(w_ref.dtype), w_ref[...],
                            preferred_element_type=jnp.float32)

    @pl.when(k == pl.num_programs(1) - 1)
    def _():
        xw = acc_ref[...] + b_ref[...]
        gate = jnp.maximum(xw[:, :h], 0.0)
        trans = jax.nn.sigmoid(xw[:, h:])
        xf = x_ref[...].astype(jnp.float32)
        o_ref[...] = (gate * (trans - xf) + xf).astype(o_ref.dtype)


# ---------------------------------------------------------------------------
# One-time parameter packing (outside the hot path)
# ---------------------------------------------------------------------------
def pack_highway_params(w_affine, b_affine, w_gate, b_gate, *,
                        matmul_dtype=jnp.bfloat16):
    """Pack PyTorch-layout Highway params once.

    Transposes (out,in)->(in,out) and fuses gate/affine halves into a single
    [h, 2*h] weight (matmul_dtype) and [1, 2*h] f32 bias. No padding: the
    kernel uses full-array-dim lane blocks, so any hidden size runs without
    wrapper-side pad/slice HBM passes.
    """
    h = w_affine.shape[0]
    w_cat = jnp.concatenate(
        [w_gate.T.astype(jnp.float32), w_affine.T.astype(jnp.float32)], axis=1
    ).astype(matmul_dtype)                                              # (h, 2h)
    b_cat = jnp.concatenate(
        [b_gate.astype(jnp.float32), b_affine.astype(jnp.float32)])[None, :]
    return w_cat, b_cat, h


# ---------------------------------------------------------------------------
# Tiling / VMEM budgeting
# ---------------------------------------------------------------------------
def _choose_tm(m, h, x_itemsize, resident_bytes, per_row_bytes, budget):
    """Rows per tile: ~4 MiB of x per tile, within the VMEM budget, and
    (when possible) at least two grid steps so v7x's second TC gets work."""
    sub = max(8, 32 // max(1, x_itemsize))        # sublane pack for x dtype
    avail = budget - resident_bytes
    per_row = max(1, per_row_bytes)
    tm_vmem = (avail // per_row) // sub * sub if avail > per_row * sub else sub
    tm_target = max(256, (4 << 20) // max(1, h * x_itemsize))
    tm_half = _round_up(_cdiv(m, 2), sub)         # keeps grid_m >= 2 when m > sub
    tm = min(tm_target, tm_vmem, tm_half, _round_up(m, sub), 4096)
    return max(sub, tm // sub * sub)


def _choose_tk(h, two_h, w_itemsize, budget):
    """Reduction tile for the K-tiled path: multiple of 128 dividing h whose
    double-buffered weight slab fits a third of the VMEM budget."""
    if h % 128 != 0:
        raise ValueError(
            f"Highway hidden size {h}: fused weight does not fit VMEM and "
            f"hidden is not a multiple of 128, so it cannot be K-tiled.")
    best, cand = 128, 128
    while cand <= h:
        if h % cand == 0 and 2 * cand * two_h * w_itemsize <= budget // 3:
            best = cand
        cand += 128
    return best


# ---------------------------------------------------------------------------
# Forward wrapper
# ---------------------------------------------------------------------------
def highway_forward(x, w_cat, b_cat, hidden, *, k_tile=None):
    """Highway forward with params pre-packed by pack_highway_params.

    x: [..., hidden] (any float dtype -- streamed/written in its own dtype);
    w_cat: [h, 2h]; b_cat: [1, 2h] f32. `k_tile` forces the K-tiled path.
    """
    h = int(hidden)
    assert x.shape[-1] == h
    assert w_cat.shape == (h, 2 * h) and b_cat.shape == (1, 2 * h)

    x2d = x.reshape(-1, h)                      # native dtype, no upcast
    m = x2d.shape[0]
    two_h = 2 * h
    xi = jnp.dtype(x2d.dtype).itemsize
    wi = jnp.dtype(w_cat.dtype).itemsize

    budget = _vmem_budget_bytes()

    cost = pl.CostEstimate(
        flops=2 * m * h * two_h,
        transcendentals=m * h,                  # sigmoid
        bytes_accessed=2 * m * h * xi + h * two_h * wi + two_h * 4,
    )

    w_resident_bytes = h * two_h * wi
    use_ktile = (k_tile is not None) or (w_resident_bytes > budget * 2 // 5)

    if not use_ktile:
        # -------- fused weight fully VMEM-resident (single-buffered) --------
        resident = w_resident_bytes + 8 * two_h * 4
        per_row = 2 * h * xi + 2 * h * xi + 3 * two_h * 4
        tm = _choose_tm(m, h, xi, resident, per_row, budget)
        out2d = pl.pallas_call(
            _highway_kernel,
            out_shape=jax.ShapeDtypeStruct((m, h), x.dtype),
            grid_spec=pltpu.PrefetchScalarGridSpec(
                num_scalar_prefetch=0,
                grid=(pl.cdiv(m, tm),),
                in_specs=[
                    pl.BlockSpec((tm, h), lambda i: (i, 0)),          # streamed
                    _resident_spec((h, two_h), lambda i: (0, 0)),     # resident W
                    _resident_spec((1, two_h), lambda i: (0, 0)),     # resident b
                ],
                out_specs=pl.BlockSpec((tm, h), lambda i: (i, 0)),
            ),
            compiler_params=pltpu.CompilerParams(
                dimension_semantics=("parallel",),
                vmem_limit_bytes=budget,
            ),
            cost_estimate=cost,
        )(x2d, w_cat, b_cat)
    else:
        # -------- K-tiled: stream (tk, 2h) weight slabs, f32 accumulator ----
        tk = int(k_tile) if k_tile is not None else _choose_tk(h, two_h, wi, budget)
        if h % tk != 0:
            raise ValueError(f"k_tile={tk} must divide hidden={h}")
        resident = 2 * tk * two_h * wi + 8 * two_h * 4
        per_row = 2 * h * xi + 2 * h * xi + 3 * two_h * 4
        tm = _choose_tm(m, h, xi, resident, per_row, budget)
        out2d = pl.pallas_call(
            _highway_kernel_ktiled,
            out_shape=jax.ShapeDtypeStruct((m, h), x.dtype),
            grid_spec=pltpu.PrefetchScalarGridSpec(
                num_scalar_prefetch=0,
                grid=(pl.cdiv(m, tm), h // tk),
                in_specs=[
                    pl.BlockSpec((tm, h), lambda i, k: (i, 0)),       # x: once per i
                    pl.BlockSpec((tk, two_h), lambda i, k: (k, 0)),   # weight slabs
                    _resident_spec((1, two_h), lambda i, k: (0, 0)),  # resident b
                ],
                out_specs=pl.BlockSpec((tm, h), lambda i, k: (i, 0)),
                scratch_shapes=[pltpu.VMEM((tm, two_h), jnp.float32)],
            ),
            compiler_params=pltpu.CompilerParams(
                dimension_semantics=("parallel", "arbitrary"),
                vmem_limit_bytes=budget,
            ),
            cost_estimate=cost,
        )(x2d, w_cat, b_cat)

    return out2d.reshape(x.shape)


# ---------------------------------------------------------------------------
# Init + references for the self-test
# ---------------------------------------------------------------------------
def _init_linear_params(key, hidden):
    """PyTorch-style nn.Linear init: U(-1/sqrt(H), 1/sqrt(H))."""
    kw, kb = jax.random.split(key)
    bound = 1.0 / jnp.sqrt(hidden)
    w = jax.random.uniform(kw, (hidden, hidden), jnp.float32, -bound, bound)
    b = jax.random.uniform(kb, (hidden,), jnp.float32, -bound, bound)
    return w, b


def _reference_f32(x, w_affine, b_affine, w_gate, b_gate):
    gate = jnp.maximum(x @ w_gate.T + b_gate, 0.0)
    trans = jax.nn.sigmoid(x @ w_affine.T + b_affine)
    return gate * trans + (1.0 - gate) * x


def _reference_matched(x, w_affine, b_affine, w_gate, b_gate, matmul_dtype):
    """Reference with the same low-precision-matmul / f32-epilogue split."""
    xf = x.astype(jnp.float32)
    xl = x.astype(matmul_dtype)
    gp = jnp.dot(xl, w_gate.T.astype(matmul_dtype),
                 preferred_element_type=jnp.float32) + b_gate
    tp = jnp.dot(xl, w_affine.T.astype(matmul_dtype),
                 preferred_element_type=jnp.float32) + b_affine
    gate = jnp.maximum(gp, 0.0)
    trans = jax.nn.sigmoid(tp)
    return gate * (trans - xf) + xf


if __name__ == "__main__":
    key = jax.random.PRNGKey(0)

    # ---- primary test: module-sized shapes (batch=2, seq=8, hidden=32) ----
    B, S, H = 2, 8, 32
    kx, ka, kg = jax.random.split(key, 3)
    x = jax.random.normal(kx, (B, S, H), jnp.float32)

    w_affine, b_affine = _init_linear_params(ka, H)
    w_gate, b_gate = _init_linear_params(kg, H)

    # One-time packing (transpose / fuse / bf16 cast) outside the hot path.
    w_cat, b_cat, hidden = pack_highway_params(
        w_affine, b_affine, w_gate, b_gate, matmul_dtype=jnp.bfloat16)

    fwd = jax.jit(functools.partial(highway_forward, hidden=hidden))
    out = jax.block_until_ready(fwd(x, w_cat, b_cat))
    assert out.shape == x.shape and out.dtype == x.dtype

    ref_matched = _reference_matched(x, w_affine, b_affine, w_gate, b_gate,
                                     jnp.bfloat16)
    assert jnp.allclose(out, ref_matched, atol=1e-4, rtol=1e-4), \
        "mismatch vs bf16-matched reference"
    ref_f32 = _reference_f32(x, w_affine, b_affine, w_gate, b_gate)
    assert jnp.allclose(out, ref_f32, atol=5e-2, rtol=5e-2), \
        "mismatch vs f32 reference"

    # ---- native bf16 streaming: x and out stay 2 bytes end to end ----
    xb = x.astype(jnp.bfloat16)
    out_b = jax.block_until_ready(fwd(xb, w_cat, b_cat))
    assert out_b.dtype == jnp.bfloat16
    ref_b = _reference_matched(xb, w_affine, b_affine, w_gate, b_gate,
                               jnp.bfloat16)
    assert jnp.allclose(out_b.astype(jnp.float32), ref_b, atol=5e-2, rtol=5e-2), \
        "mismatch on bf16-streamed input"

    # ---- K-tiled fallback path (forced small k_tile so both axes run) ----
    H2, B2, S2 = 256, 4, 32
    k2x, k2a, k2g = jax.random.split(jax.random.PRNGKey(1), 3)
    x2 = jax.random.normal(k2x, (B2, S2, H2), jnp.float32)
    w_a2, b_a2 = _init_linear_params(k2a, H2)
    w_g2, b_g2 = _init_linear_params(k2g, H2)
    w_cat2, b_cat2, hidden2 = pack_highway_params(w_a2, b_a2, w_g2, b_g2)
    fwd_kt = jax.jit(functools.partial(highway_forward, hidden=hidden2,
                                       k_tile=128))
    out2 = jax.block_until_ready(fwd_kt(x2, w_cat2, b_cat2))
    ref2 = _reference_matched(x2, w_a2, b_a2, w_g2, b_g2, jnp.bfloat16)
    assert jnp.allclose(out2, ref2, atol=5e-4, rtol=5e-4), \
        "mismatch on K-tiled path"

    print("KERNEL_OK")
</pallas_src>

<mosaic_0001>
module attributes {stable_mosaic.version = 11 : i64} {
  func.func @_highway_kernel(%arg0: i32, %arg1: memref<8x32xf32, #tpu.memory_space<vmem>>, %arg2: memref<32x64xbf16, #tpu.memory_space<vmem>>, %arg3: memref<1x64xf32, #tpu.memory_space<vmem>>, %arg4: memref<8x32xf32, #tpu.memory_space<vmem>>) attributes {dimension_semantics = [#tpu.dimension_semantics<parallel>], iteration_bounds = array<i64: 2>, scalar_prefetch = 0 : i64, scratch_operands = 0 : i64, tpu.core_type = #tpu.core_type<tc>, window_params = [{transform_indices = @transform_0, window_bounds = array<i64: 8, 32>}, {pipeline_mode = #tpu.pipeline_mode<synchronous>, transform_indices = @transform_1, window_bounds = array<i64: 32, 64>}, {pipeline_mode = #tpu.pipeline_mode<synchronous>, transform_indices = @transform_2, window_bounds = array<i64: 1, 64>}, {transform_indices = @transform_3, window_bounds = array<i64: 8, 32>}]} {
    %c0 = arith.constant 0 : index
    %c0_0 = arith.constant 0 : index
    %0 = vector.load %arg1[%c0, %c0_0] : memref<8x32xf32, #tpu.memory_space<vmem>>, vector<8x32xf32>
    %1 = arith.truncf %0 : vector<8x32xf32> to vector<8x32xbf16>
    %c0_1 = arith.constant 0 : index
    %c0_2 = arith.constant 0 : index
    %2 = vector.load %arg2[%c0_1, %c0_2] : memref<32x64xbf16, #tpu.memory_space<vmem>>, vector<32x64xbf16>
    %cst = arith.constant dense<0.000000e+00> : vector<8x64xf32>
    %3 = tpu.matmul %1, %2, %cst {dimension_numbers = #tpu.dot_dimension_numbers<[1], [0], [0], [1], [0, 0, 1, 1], [], []>} : vector<8x32xbf16>, vector<32x64xbf16>, vector<8x64xf32> -> vector<8x64xf32>
    %c0_3 = arith.constant 0 : index
    %c0_4 = arith.constant 0 : index
    %4 = vector.load %arg3[%c0_3, %c0_4] : memref<1x64xf32, #tpu.memory_space<vmem>>, vector<1x64xf32>
    %5 = vector.broadcast %4 : vector<1x64xf32> to vector<8x64xf32>
    %6 = arith.addf %3, %5 : vector<8x64xf32>
    %7 = vector.extract_strided_slice %6 {offsets = [0, 0], sizes = [8, 32], strides = [1, 1]} : vector<8x64xf32> to vector<8x32xf32>
    %cst_5 = arith.constant 0.000000e+00 : f32
    %8 = vector.broadcast %cst_5 : f32 to vector<8x32xf32>
    %9 = arith.maximumf %7, %8 : vector<8x32xf32>
    %10 = vector.extract_strided_slice %6 {offsets = [0, 32], sizes = [8, 32], strides = [1, 1]} : vector<8x64xf32> to vector<8x32xf32>
    %11 = arith.negf %10 : vector<8x32xf32>
    %12 = math.exp %11 : vector<8x32xf32>
    %cst_6 = arith.constant 1.000000e+00 : f32
    %13 = vector.broadcast %cst_6 : f32 to vector<8x32xf32>
    %14 = arith.addf %13, %12 : vector<8x32xf32>
    %15 = arith.divf %13, %14 : vector<8x32xf32>
    %16 = arith.subf %15, %0 : vector<8x32xf32>
    %17 = arith.mulf %9, %16 : vector<8x32xf32>
    %18 = arith.addf %17, %0 : vector<8x32xf32>
    %c0_7 = arith.constant 0 : index
    %c0_8 = arith.constant 0 : index
    %19 = vector.load %arg4[%c0_7, %c0_8] : memref<8x32xf32, #tpu.memory_space<vmem>>, vector<8x32xf32>
    tpu.vector_store %arg4[%c0_7, %c0_8], %18 {strides = array<i32>} : memref<8x32xf32, #tpu.memory_space<vmem>>, vector<8x32xf32>,
    return
  }
  func.func @transform_0(%arg0: i32) -> (i32, i32) {
    %c0_i32 = arith.constant 0 : i32
    %c0_i32_0 = arith.constant 0 : i32
    return %arg0, %c0_i32 : i32, i32
  }
  func.func @transform_1(%arg0: i32) -> (i32, i32) {
    %c0_i32 = arith.constant 0 : i32
    %c0_i32_0 = arith.constant 0 : i32
    %c0_i32_1 = arith.constant 0 : i32
    return %c0_i32, %c0_i32_0 : i32, i32
  }
  func.func @transform_2(%arg0: i32) -> (i32, i32) {
    %c0_i32 = arith.constant 0 : i32
    %c0_i32_0 = arith.constant 0 : i32
    %c0_i32_1 = arith.constant 0 : i32
    return %c0_i32, %c0_i32_0 : i32, i32
  }
  func.func @transform_3(%arg0: i32) -> (i32, i32) {
    %c0_i32 = arith.constant 0 : i32
    %c0_i32_0 = arith.constant 0 : i32
    return %arg0, %c0_i32 : i32, i32
  }
}

</mosaic_0001>

<bundles_post_ra>
// kernel: highway_forward.1
= control target key start
LH: loop header
LB: loop body
LE: loop exit
PB: predicated region body
PF: predicated region fallthrough
CT: control target
= control target key end

     0   :  { %8 = vsyncpa [#allocation3], 0  ;;  %s767_s0 = inlined_call_operand.hbm [shape: f32[16,32], index: 0, kind: input, shape index: {}]   ;;  %s768_s1 = inlined_call_operand.hbm [shape: bf16[32,64], index: 1, kind: input, shape index: {}]   ;;  %s769_s2 = inlined_call_operand.vmem [shape: f32[1,64], index: 2, kind: input, shape index: {}]   ;;  %s770_s3 = inlined_call_operand.hbm [shape: f32[16,32], index: 3, kind: output, shape index: {}]  }
   0x1   :  { %10 = vsyncpa [#allocation3 + $0x1], 0 }
   0x2   :  { %11 = vsyncpa [#allocation6], 0 }
   0x3   :  { %12 = vsyncpa [#allocation4], 0 }
   0x4   :  { %14 = vsyncpa [#allocation4 + $0x1], 0  ;;  %s622_s12 = smov 0   ;;  %s624_s13 = smov 0  }
   0x5   :  { %s626_s14 = smov 0   ;;  %s628_s15 = smov 0  }
   0x6 LB: > { %s130_s18 = sshll.u32 %s768_s1, 4  ;;  %s646_s19 = sadd.s32 4294967295, %s595_s15   ;;  %s595_s15 = sphi %s628_s15, %s780_s15   ;;  %s591_s14 = sphi %s626_s14, %s779_s14   ;;  %s587_s13 = sphi %s624_s13, %s778_s13   ;;  %s583_s12 = sphi %s622_s12, %s777_s12   ;;  %s131_s18 = int_to_ptr.hbm [resolvable:$true] %s130_s18 }
   0x7   : > { %p374_p0 = scmp.ge.s32.totalorder %s595_s15, 1  ;;  %p41_p1 = scmp.eq.s32.totalorder %s646_s19, 0 }
   0x8   : > { %p119_p2 = scmp.lt.s32.totalorder %s595_s15, 3  ;;  %s597_s21 = smov [#allocation5]  }
   0x9   : > { %s132_s22 = sshll.u32 %s597_s21, 4  ;;  %s598_s23 = smov 64   ;;  %s133_s22 = int_to_ptr.vmem [resolvable:$true] %s132_s22 }
   0xa   : > { %p651_p3 = pnand %p374_p0, %p119_p2  ;;  %s599_s24 = smov 4  }
   0xb   : > { %s373_s25 = sadd.s32 4294967294, %s595_s15   ;;  %s662_s26 = sadd.s32 1, %s595_s15  }
   0xc   : > { %p407_p4 = pneg %p651_p3  ;;  %s27_s27 = sadd.s32 1, %s591_s14 }
   0xd   : > { %s24_s28 = ssub.s32 %s595_s15, %s662_s26  ;;  %p34_p7 = scmp.ne.s32.totalorder %s591_s14, %s587_s13 }
   0xe   : > { %p408_p6 = pnand %p407_p4, %p41_p1  ;;  %p25_p8 = scmp.eq.s32.totalorder %s24_s28, 0 }
   0xf   : > { %p35_p9 = scmp.eq.s32.totalorder %s595_s15, 0  ;;  %p40_p10 = scmp.ne.s32.totalorder %s587_s13, %s583_s12 }
  0x10   : > { %410 = dma.hbm_to_vmem [thread:$0]  (!%p408_p6), %s131_s18, 256, %s133_s22, [#allocation6], %s598_s23, %s598_s23, %s599_s24  }
  0x11   : > { %p106_p11 = scmp.eq.s32.totalorder %s646_s19, 1  ;;  %p678_p12 = por %p41_p1, %p40_p10 }
  0x12   : > { %s674_s29 = scalar_select %p25_p8, %s591_s14, %s27_s27  }
  0x13   : > { %p682_p13 = por %p106_p11, %p34_p7  ;;  %p112_p0 = scmp.eq.s32.totalorder %s373_s25, 1 }
  0x14   : > { %p36_p2 = por %p35_p9, %p34_p7  ;;  %s149_s5 = sand.u32 1, %s591_s14  }
  0x15   : > { %p687_p4 = por %p112_p0, %p40_p10  ;;  %p420_p6 = scmp.lt.s32.totalorder %s595_s15, 2 }
  0x16   : > { %s377_s7 = sshll.u32 %s149_s5, 3  ;;  %s378_s8 = sshll.u32 %s595_s15, 3 }
  0x17   : > { %s157_s11 = scalar_lea.hbm %s767_s0, %s378_s8  ;;  %s153_s17 = scalar_lea.vmem [#allocation2], %s377_s7 }
  0x18   : > { %s159_s16 = sshll.u32 %s157_s11, 4  ;;  %s161_s18 = sshll.u32 %s153_s17, 4  ;;  %s160_s16 = int_to_ptr.hbm [resolvable:$true] %s159_s16  ;;  %s162_s18 = int_to_ptr.vmem [resolvable:$true] %s161_s18 }
  0x19   : > { %p696_p8 = pnand %p420_p6, %p36_p2  ;;  %s150_s22 = scalar_lea.sflag [#allocation3], %s149_s5 }
  0x1a   : > { %s495_s23 = sshra.s32 %s160_s16, 4  ;;  %s502_s28 = scalar_lea.hbm %s767_s0, 16  ;;  %s496_s23 = int_to_ptr.hbm [resolvable:$true] %s495_s23 }
  0x1b   : > { %s497_s24 = scalar_lea.hbm %s496_s23, 8  ;;  %p499_p9 = pneg %p696_p8 }
  0x1c   : > { %p498_p7 = scmp.ne.s32.totalorder %s496_s23, %s497_s24  ;;  %p503_p0 = scmp.lt.s32.totalorder %s496_s23, %s767_s0 }
  0x1d   : > { %p504_p2 = scmp.lt.s32.totalorder %s502_s28, %s497_s24 }
  0x1e   : > { %p500_p10 = pnand %p499_p9, %p498_p7 }
  0x1f   : > { %p505_p6 = por %p504_p2, %p503_p0 }
  0x20   : > { %p501_p11 = pneg %p500_p10 }
  0x22   : > { %p506_p5 = pnand %p505_p6, %p501_p11 }
  0x24   : > { %509 = shalt.err (!%p506_p5)
}
  0x25   : > { %414 = dma.hbm_to_vmem [thread:$0]  (!%p696_p8), %s160_s16, 128, %s162_s18, %s150_s22  }
  0x26   : > { %170 = sbr.rel (%p651_p3) target bundleno = 334 (0x14e), region = 32  ;;  %s713_s5 = sand.u32 (!%p651_p3), 1, %s587_s13  }
  0x27   : > { %s380_s9 = sshll.u32 (!%p651_p3), %s713_s5, 3  ;;  %s173_s10 = scalar_lea.sflag (!%p651_p3), [#allocation3], %s713_s5 }
  0x28   : > { %s176_s11 = scalar_lea.vmem (!%p651_p3), [#allocation2], %s380_s9 }
  0x2b   : > { %570 = dma.done.wait (%p678_p12), %s173_s10, 128  }
  0x2c   : > { %572 = vsyncadd (%p678_p12), %s173_s10, 4294967168 }
  0x2d   : > { %574 = dma.done.wait (%p41_p1), [#allocation6], 256  }
  0x2e   : > { %576 = vsyncadd (%p41_p1), [#allocation6], 4294967040  ;;  %v398_v0 = vld [vmem:[#allocation5 + $0x8] sm:$0xff]  ;;  %v206_v1 = vld [vmem:[%s176_s11] sm:$0xff]  ;;  %s600_s20 = smov 32   ;;  %vm228_vm0 = vcmask 261120  }
  0x2f   : > { %266 = vrot.lane.b32.xlu0 %v206_v1, %s600_s20  ;;  %238 = vmatpush.bf16.msra.mxu0 %v398_v0  ;;  %v397_v2 = vld [vmem:[#allocation5] sm:$0xff]  ;;  %v207_v3 = vpack.c.bf16 %v206_v1, %v206_v1  ;;  %v460_v4 = vld [vmem:[%s769_s2] ss:$0 sm:$0xff]  ;;  %s601_s17 = smov 96   ;;  %s394_s18 = sshll.u32 %s646_s19, 3 }
  0x30   : > { %s288_s23 = scalar_lea.hbm %s770_s3, %s394_s18  ;;  %s204_s24 = scalar_lea.vmem [#allocation7], %s380_s9 }
  0x31   : > { %s290_s25 = sshll.u32 %s204_s24, 4  ;;  %s292_s27 = sshll.u32 %s288_s23, 4  ;;  %s291_s25 = int_to_ptr.vmem [resolvable:$true] %s290_s25  ;;  %s293_s27 = int_to_ptr.hbm [resolvable:$true] %s292_s27 }
  0x32   : > { %s278_s28 = scalar_lea.sflag [#allocation4], %s713_s5  ;;  %s539_s7 = sshra.s32 %s293_s27, 4  ;;  %s540_s7 = int_to_ptr.hbm [resolvable:$true] %s539_s7 }
  0x33   : > { %239 = vmatpush.bf16.msra.mxu0 %v397_v2  ;;  %s541_s19 = scalar_lea.hbm %s540_s7, 8  ;;  %s545_s9 = scalar_lea.hbm %s770_s3, 16 }
  0x34   : > { %p542_p1 = scmp.ne.s32.totalorder %s540_s7, %s541_s19  ;;  %p546_p12 = scmp.lt.s32.totalorder %s540_s7, %s770_s3 }
  0x35   : > { %p547_p8 = scmp.lt.s32.totalorder %s545_s9, %s541_s19 }
  0x36   : > { %391 = vmatmul.msk.bf16.vlgmr.msra.gmra.mxu0 %vm228_vm0, %v207_v3  ;;  %p543_p3 = pnand %p542_p1, %p682_p13 }
  0x37   : > { %p548_p7 = por %p547_p8, %p546_p12 }
  0x38   : > { %p544_p5 = pneg %p543_p3 }
  0x3a   : > { %p549_p9 = pnand %p548_p7, %p544_p5 }
  0xa1   : > { %v267_v18 = vpop.permute.xlu0 %266 }
  0xb3   : > { %v241_v5 = vpop.f32.mrf.mxu0 }
  0xb4   : > { %v242_v6 = vadd.f32 %v460_v4, %v241_v5 }
  0xb6   : > { %v392_v7 = vmul.f32 -1.442695, %v242_v6  ;;  %v245_v23 = vmax.f32 %v242_v6, 0.0 }
  0xb8   : > { %461 = vpow2.f32 %v392_v7 }
  0xbb   : > { %v243_v8 = vpop.f32.mrf.mxu0 }
  0xbe   : > { %v462_v9 = vpop.eup %461 }
  0xbf   : > { %v249_v10 = vadd.f32 1.0, %v462_v9 }
  0xc1   : > { %463 = vrcp.f32 %v249_v10  ;;  %v261_v14 = vand.u32 2147483648, %v249_v10  ;;  %v259_v16 = vand.u32 2147483647, %v249_v10  ;;  %vm255_vm2 = vweird.f32 %v249_v10 }
  0xc3   : > { %v262_v19 = vor.u32 1.1754944e-38, %v261_v14  ;;  %vm260_vm4 = vcmp.eq.f32.partialorder %v259_v16, 8.507059e+37 }
  0xc7   : > { %v464_v11 = vpop.eup %463 }
  0xc8   : > { %v251_v12 = vmul.f32 %v464_v11, %v249_v10  ;;  %vm256_vm1 = vweird.f32 %v464_v11 }
  0xc9   : > { %vm257_vm3 = vmor %vm255_vm2, %vm256_vm1 }
  0xca   : > { %v252_v13 = vsub.f32 1.0, %v251_v12 }
  0xcc   : > { %v253_v15 = vmul.f32 %v464_v11, %v252_v13 }
  0xce   : > { %v254_v17 = vadd.f32 %v464_v11, %v253_v15 }
  0xd0   : > { %v258_v20 = vsel %vm257_vm3, %v464_v11, %v254_v17 }
  0xd1   : > { %v263_v21 = vsel %vm260_vm4, %v262_v19, %v258_v20 }
  0xd2   : > { %v269_v22 = vsub.f32 %v263_v21, %v267_v18 }
  0xd4   : > { %271 = vrot.lane.b32.xlu0 %v269_v22, %s601_s17 }
 0x146   : > { %v272_v24 = vpop.permute.xlu0 %271 }
 0x147   : > { %v274_v25 = vmul.f32 %v272_v24, %v245_v23 }
 0x149   : > { %v275_v26 = vadd.f32 %v274_v25, %v206_v1 }
 0x14b   : > { %276 = vst.msk [vmem:[%s204_s24] sm:$0xff] %vm228_vm0, %v275_v26 }
 0x14c   : > { %552 = shalt.err (!%p549_p9)
}
 0x14d   : > { %405 = dma.vmem_to_hbm [thread:$0]  (%p682_p13), %s291_s25, 128, %s293_s27, %s278_s28  }
 0x14e PF: > { %s304_s5 = sand.u32 1, %s583_s12   ;;  %p776_p10 = scmp.ge.s32.totalorder %s595_s15, 2 }
 0x14f   : > { %s305_s16 = scalar_lea.sflag [#allocation4], %s304_s5 }
 0x150   : > { %p416_p11 = pnand %p776_p10, %p687_p4 }
 0x152   : > { %p417_p0 = pneg %p416_p11 }
 0x154   : > { %578 = dma.done.wait (%p417_p0), %s305_s16, 128  }
 0x155   : > { %580 = vsyncadd (%p417_p0), %s305_s16, 4294967168  ;;  %p17_p2 = scmp.ge.s32.totalorder %s662_s26, 4   ;;  %s777_s12 = smov %s587_s13 }
 0x156   : > { %s778_s13 = smov %s591_s14  ;;  %s779_s14 = smov %s674_s29 }
 0x157   : > { %s780_s15 = smov %s662_s26  ;;  %19 = sbr.rel (!%p17_p2) target bundleno = 6 (0x6), region = 81 }
 0x15c   :  { %311 = vsyncpa [#allocation3], 1 }
 0x15d   :  { %313 = vsyncpa [#allocation3 + $0x1], 1 }
 0x15e   :  { %314 = vsyncpa [#allocation6], 1 }
 0x15f   :  { %315 = vsyncpa [#allocation4], 1 }
 0x160   :  { %317 = vsyncpa [#allocation4 + $0x1], 1 }

</bundles_post_ra>
